<compile_context>
chip_gen: v5e
topology: v5e:2x2
jax: 0.10.0
libtpu: 0.0.40
codegen_flags: <defaults>
</compile_context>

<pallas_src>
import math

import jax
import jax.numpy as jnp
from jax.experimental import pallas as pl
from jax.experimental.pallas import tpu as pltpu


def _copy_kernel(x_ref, o_ref):
    # Pure data movement: copy the current lane/sublane-dense block.
    o_ref[...] = x_ref[...]


def _pick_lane_cols(total, max_cols=2048):
    """Largest multiple of 128 that divides `total`, capped at max_cols (0 if none)."""
    cap = (min(total, max_cols) // 128) * 128
    for c in range(cap, 0, -128):
        if total % c == 0:
            return c
    return 0


def flatten(x, *, force_kernel=False,
            small_bytes=256 * 1024,
            target_block_bytes=2 * 1024 * 1024):
    """Equivalent of Flatten.forward: returns x reshaped to (N, prod(rest))."""
    n = x.shape[0]
    f = math.prod(x.shape[1:])  # == 1 for 1-D input, matching torch.prod of empty
    out_shape = (n, f)

    total = n * f
    itemsize = jnp.dtype(x.dtype).itemsize

    # Fast path: Flatten is metadata-only.  For small inputs the per-grid-step
    # pipeline overhead (~0.35 us/step) dwarfs the data movement, so the free
    # reshape is strictly faster on every TPU generation.
    if total == 0 or (not force_kernel and total * itemsize <= small_bytes):
        return x.reshape(out_shape)

    # Lay the whole flattened buffer out as a lane-dense (rows, cols) slab:
    # cols is a large multiple of 128 -> full-width unmasked stores and
    # contiguous multi-KiB DMA descriptors instead of tiny strided rows.
    cols = _pick_lane_cols(total)
    if cols == 0:
        # Not 128-factorable: a masked-edge copy buys nothing over the free
        # metadata-only reshape, so skip the kernel.
        return x.reshape(out_shape)

    rows = total // cols
    slab = x.reshape(rows, cols)  # metadata-only, row-major order preserved

    # Row tile: multiple of 8 (full f32 sublanes) sized so double-buffered
    # in+out blocks (4 * block_bytes) stay well under the scoped VMEM limit on
    # all generations (v5e 16 MiB default, v7x 32 MiB scoped of 64 MiB phys).
    max_tile_rows = max(1, target_block_bytes // (cols * itemsize))
    if rows <= max_tile_rows:
        tile_rows = rows                      # single full-extent block
    else:
        tile_rows = max(8, (max_tile_rows // 8) * 8)

    grid = (pl.cdiv(rows, tile_rows),)

    out = pl.pallas_call(
        _copy_kernel,
        out_shape=jax.ShapeDtypeStruct((rows, cols), x.dtype),
        grid=grid,
        in_specs=[pl.BlockSpec((tile_rows, cols), lambda i: (i, 0))],
        out_specs=pl.BlockSpec((tile_rows, cols), lambda i: (i, 0)),
        compiler_params=pltpu.CompilerParams(
            # Pure copy: grid axis is fully independent -> shard across both
            # TensorCores on v7x (no effect on v5e/v6e, harmless).
            dimension_semantics=("parallel",),
            vmem_limit_bytes=32 * 1024 * 1024,
        ),
    )(slab)

    # TODO(synk): if the caller can donate x, input_output_aliases={0: 0} would
    # elide the HBM round-trip entirely; omitted since donation isn't guaranteed.

    return out.reshape(out_shape)  # metadata-only


if __name__ == "__main__":
    key = jax.random.PRNGKey(0)
    # Small NCHW input consistent with the module's usage: (N=2, C=4, H=16, W=16)
    x = jax.random.normal(key, (2, 4, 16, 16), dtype=jnp.float32)
    expected = x.reshape(x.shape[0], -1)

    # Default path: small input -> metadata-only fast path.
    y_fast = flatten(x)
    jax.block_until_ready(y_fast)
    assert y_fast.shape == (2, 4 * 16 * 16), y_fast.shape
    assert y_fast.dtype == x.dtype
    assert jnp.array_equal(y_fast, expected), "flatten fast-path mismatch"

    # Force the Pallas copy-kernel path on the same input to exercise it.
    y_kernel = flatten(x, force_kernel=True)
    jax.block_until_ready(y_kernel)
    assert y_kernel.shape == (2, 4 * 16 * 16), y_kernel.shape
    assert y_kernel.dtype == x.dtype
    assert jnp.array_equal(y_kernel, expected), "flatten kernel-path mismatch"

    # Slightly larger (still small) input through the kernel path as well.
    x2 = jax.random.normal(jax.random.PRNGKey(0), (8, 4, 32, 32), dtype=jnp.float32)
    y2 = flatten(x2, force_kernel=True)
    jax.block_until_ready(y2)
    assert y2.shape == (8, 4 * 32 * 32), y2.shape
    assert jnp.array_equal(y2, x2.reshape(8, -1)), "flatten kernel-path mismatch (x2)"

    print("KERNEL_OK")
</pallas_src>

<mosaic_0001>
module attributes {stable_mosaic.version = 11 : i64} {
  func.func @_copy_kernel(%arg0: i32, %arg1: memref<1x2048xf32, #tpu.memory_space<vmem>>, %arg2: memref<1x2048xf32, #tpu.memory_space<vmem>>) attributes {dimension_semantics = [#tpu.dimension_semantics<parallel>], iteration_bounds = array<i64: 1>, scalar_prefetch = 0 : i64, scratch_operands = 0 : i64, tpu.core_type = #tpu.core_type<tc>, window_params = [{transform_indices = @transform_0, window_bounds = array<i64: 1, 2048>}, {transform_indices = @transform_1, window_bounds = array<i64: 1, 2048>}]} {
    %c0 = arith.constant 0 : index
    %c0_0 = arith.constant 0 : index
    %0 = vector.load %arg1[%c0, %c0_0] : memref<1x2048xf32, #tpu.memory_space<vmem>>, vector<1x2048xf32>
    %c0_1 = arith.constant 0 : index
    %c0_2 = arith.constant 0 : index
    %1 = vector.load %arg2[%c0_1, %c0_2] : memref<1x2048xf32, #tpu.memory_space<vmem>>, vector<1x2048xf32>
    tpu.vector_store %arg2[%c0_1, %c0_2], %0 {strides = array<i32>} : memref<1x2048xf32, #tpu.memory_space<vmem>>, vector<1x2048xf32>,
    return
  }
  func.func @transform_0(%arg0: i32) -> (i32, i32) {
    %c0_i32 = arith.constant 0 : i32
    %c0_i32_0 = arith.constant 0 : i32
    return %arg0, %c0_i32 : i32, i32
  }
  func.func @transform_1(%arg0: i32) -> (i32, i32) {
    %c0_i32 = arith.constant 0 : i32
    %c0_i32_0 = arith.constant 0 : i32
    return %arg0, %c0_i32 : i32, i32
  }
}

</mosaic_0001>

<bundles_post_ra>
// kernel: tpu_custom_call.1
= control target key start
LH: loop header
LB: loop body
LE: loop exit
PB: predicated region body
PF: predicated region fallthrough
CT: control target
= control target key end

     0   :  { %6 = vsyncpa [#allocation3], 0  ;;  %s116_s0 = inlined_call_operand.hbm [shape: f32[1,2048], index: 0, kind: input, shape index: {}]   ;;  %s117_s1 = inlined_call_operand.hbm [shape: f32[1,2048], index: 1, kind: output, shape index: {}]  }
   0x1   :  { %7 = vsyncpa [#allocation4], 0  ;;  %s13_s8 = sshll.u32 %s116_s0, 4  ;;  %s98_s9 = smov [#allocation2]   ;;  %s14_s8 = int_to_ptr.hbm [resolvable:$true] %s13_s8 }
   0x2   :  { %s15_s10 = sshll.u32 %s98_s9, 4  ;;  %s16_s10 = int_to_ptr.vmem [resolvable:$true] %s15_s10 }
   0x3   :  { %18 = dma.hbm_to_vmem [thread:$0]  %s14_s8, 256, %s16_s10, [#allocation3]  }
   0x4   :  { %94 = dma.done.wait [#allocation3], 256  }
   0x5   :  { %95 = vsyncadd [#allocation3], 4294967040  ;;  %s99_s11 = smov [#allocation5]   ;;  %s34_s15 = sshll.u32 %s117_s1, 4  ;;  %v23_v0 = vld [vmem:[#allocation2] sm:$0xff]  ;;  %v24_v1 = vld [vmem:[#allocation2 + $0x8] sm:$0xff]  ;;  %s35_s15 = int_to_ptr.hbm [resolvable:$true] %s34_s15 }
   0x6   :  { %s32_s12 = sshll.u32 %s99_s11, 4  ;;  %25 = vst [vmem:[#allocation5] sm:$0xff] %v23_v0  ;;  %s33_s12 = int_to_ptr.vmem [resolvable:$true] %s32_s12 }
   0x7   :  { %26 = vst [vmem:[#allocation5 + $0x8] sm:$0xff] %v24_v1 }
   0x8   :  { %37 = dma.vmem_to_hbm [thread:$0]  %s33_s12, 256, %s35_s15, [#allocation4]  }
   0x9   :  { %96 = dma.done.wait [#allocation4], 256  }
   0xa   :  { %97 = vsyncadd [#allocation4], 4294967040 }
   0xb   :  { %42 = vsyncpa [#allocation3], 1 }
   0xc   :  { %43 = vsyncpa [#allocation4], 1 }

</bundles_post_ra>
